<compile_context>
chip_gen: v7x
topology: tpu7x:2x2x1
jax: 0.10.0
libtpu: 0.0.40
codegen_flags: <defaults>
</compile_context>

<pallas_src>
import jax
import jax.numpy as jnp
from jax.experimental import pallas as pl
from jax.experimental.pallas import tpu as pltpu


def _round_up(v, m):
    return (v + m - 1) // m * m


def _packing_dims(n_features):
    """Per-group padded width NP, groups per 128-lane row G, packed width KP = G*NP."""
    lane = 128
    if n_features >= lane:
        np_ = _round_up(n_features, lane)
        return np_, 1, np_
    np_ = n_features
    while lane % np_ != 0:       # smallest width >= N that divides 128
        np_ += 1
    g = lane // np_
    return np_, g, lane


def discriminator_kernel(x_ref, w0_ref, b0_ref, w1_ref, b1_ref, wo_ref, bo_ref, o_ref):
    # Hoist every ref load once: the 3x loop below unrolls statically and JAX does not CSE
    # repeated ref loads / broadcasts.
    x = x_ref[...]      # (R, KP)  bf16 : G batch samples packed along the lane axis
    w0 = w0_ref[...]    # (KP, KP) bf16 : block-diagonal, G copies of the NxN hidden0 weights
    b0 = b0_ref[...]    # (1, KP)  f32  : bias tiled G times
    w1 = w1_ref[...]    # (KP, KP) bf16 : tied hidden1 weights (reused 3x)
    b1 = b1_ref[...]    # (1, KP)  f32
    wo = wo_ref[...]    # (KP, G)  f32  : block-diagonal output projection
    bo = bo_ref[...]    # (1, G)   f32

    # hidden0: Linear + LeakyReLU(0.2).  Dropout(0.3) == identity (eval mode).
    h = jnp.dot(x, w0, preferred_element_type=jnp.float32) + b0
    h = jnp.maximum(h, 0.2 * h)

    # hidden1 applied three times with the SAME W1/b1 (matches the PyTorch forward).
    for _ in range(3):
        h = jnp.dot(h.astype(jnp.bfloat16), w1, preferred_element_type=jnp.float32) + b1
        h = jnp.maximum(h, 0.2 * h)

    # out: one narrow MXU pass (the MXU has slack) -> (R, G); column g is sample G*row + g,
    # so the tile flattens row-major straight into batch order.  Exact sigmoid keeps y in [0,1].
    logits = jnp.dot(h, wo, preferred_element_type=jnp.float32) + bo
    o_ref[...] = (1.0 / (1.0 + jnp.exp(-logits))).astype(o_ref.dtype)


def pack_params(params, n_features):
    """One-time packing of f32 [in, out] weights into MXU-friendly block-diagonal slabs.
    Call once and reuse; the per-call forward only touches x."""
    NP, G, KP = _packing_dims(n_features)
    f32, bf16 = jnp.float32, jnp.bfloat16

    def blk(a, rows, cols):
        out = jnp.zeros((rows, cols), f32)
        return out.at[: a.shape[0], : a.shape[1]].set(a.astype(f32))

    eye = jnp.eye(G, dtype=f32)
    # kron(I_G, A) == blockdiag(A, ..., A): padded rows/cols are zero, so padded lanes of the
    # packed activations stay exactly 0 through every layer.
    w0 = jnp.kron(eye, blk(params["w0"], NP, NP))               # (KP, KP)
    w1 = jnp.kron(eye, blk(params["w1"], NP, NP))               # (KP, KP)
    wo = jnp.kron(eye, blk(params["wo"], NP, 1))                # (KP, G)
    b0 = jnp.tile(blk(params["b0"], 1, NP), (1, G))             # (1, KP)
    b1 = jnp.tile(blk(params["b1"], 1, NP), (1, G))             # (1, KP)
    bo = jnp.tile(params["bo"].astype(f32).reshape(1, 1), (1, G))  # (1, G)

    return {"w0": w0.astype(bf16), "b0": b0,
            "w1": w1.astype(bf16), "b1": b1,
            "wo": wo, "bo": bo}


def discriminator_forward(x, packed, *, tile_b=1024):
    """x: [B, N] float32.  packed: output of pack_params (block-diagonal slabs)."""
    B, N = x.shape
    NP, G, KP = _packing_dims(N)
    assert packed["w0"].shape == (KP, KP), "packed params do not match x's feature count"
    f32, bf16 = jnp.float32, jnp.bfloat16

    # Batch tiling: G samples pack into one 128-lane row, 8 rows per sublane tile.
    row_align = G * 8
    if B <= tile_b:
        n_tiles = 1
        tile_b = max(row_align, _round_up(B, row_align))
    else:
        n_tiles = 2 * pl.cdiv(B, 2 * tile_b)        # even tile count: keep both v7x TCs busy
        tile_b = _round_up(pl.cdiv(B, n_tiles), row_align)
    BP = n_tiles * tile_b
    rows = tile_b // G                               # packed rows per tile
    rows_total = BP // G

    # Per-call plumbing touches ONLY x: bf16 cast, pad, pack G samples per 128-lane row.
    # (For N=32 there is no feature padding at all -> 4x less x traffic than padding to 128.)
    x_b = x.astype(bf16)
    if NP != N:
        x_b = jnp.pad(x_b, ((0, 0), (0, NP - N)))
    if BP != B:
        x_b = jnp.pad(x_b, ((0, BP - B), (0, 0)))
    x_packed = x_b.reshape(rows_total, KP)

    def resident(shape):
        # Weights/biases stay VMEM-resident across all batch tiles (constant index_map).
        # (pipeline_mode=pl.Buffered(1) would drop their 2nd buffer; at KP=128 it is noise.)
        return pl.BlockSpec(shape, lambda i: (0, 0))

    flops = 2 * rows_total * KP * (4 * KP + G) + 12 * rows_total * KP
    bytes_accessed = (x_packed.size * 2 + 2 * KP * KP * 2
                      + 2 * KP * 4 + KP * G * 4 + G * 4 + rows_total * G * 4)
    vmem_need = (2 * rows * KP * 2                    # x tile, double-buffered
                 + 2 * rows * G * 4                   # out tile, double-buffered
                 + 2 * (2 * KP * KP * 2)              # w0/w1 (default double buffers)
                 + 2 * (2 * KP * 4 + KP * G * 4 + G * 4))

    out = pl.pallas_call(
        discriminator_kernel,
        out_shape=jax.ShapeDtypeStruct((rows_total, G), f32),
        grid_spec=pltpu.PrefetchScalarGridSpec(
            num_scalar_prefetch=0,
            grid=(n_tiles,),
            in_specs=[
                pl.BlockSpec((rows, KP), lambda i: (i, 0)),   # x: pipelined batch tiles
                resident((KP, KP)),                           # w0
                resident((1, KP)),                            # b0
                resident((KP, KP)),                           # w1 (tied, reused 3x)
                resident((1, KP)),                            # b1
                resident((KP, G)),                            # wo
                resident((1, G)),                             # bo
            ],
            out_specs=pl.BlockSpec((rows, G), lambda i: (i, 0)),
        ),
        compiler_params=pltpu.CompilerParams(
            # batch tiles are independent -> shard across v7x's 2 TCs (no-op on v5e/v6e)
            dimension_semantics=("parallel",),
            vmem_limit_bytes=int(vmem_need + (8 << 20)),
        ),
        cost_estimate=pl.CostEstimate(
            flops=int(flops),
            transcendentals=int(rows_total * G),
            bytes_accessed=int(bytes_accessed),
        ),
    )(x_packed, packed["w0"], packed["b0"], packed["w1"], packed["b1"],
      packed["wo"], packed["bo"])

    # (R, G) flattens row-major into batch order; drop padded samples.
    return out.reshape(BP)[:B].reshape(B, 1)


def reference_forward(x, params):
    """Pure-JAX f32 reference of the PyTorch forward (eval mode)."""
    def lrelu(v):
        return jnp.maximum(v, 0.2 * v)
    h = lrelu(x @ params["w0"] + params["b0"])
    for _ in range(3):
        h = lrelu(h @ params["w1"] + params["b1"])
    return jax.nn.sigmoid(h @ params["wo"] + params["bo"])


def init_params(key, n_features):
    """Deterministic init mimicking torch.nn.Linear default (U[-1/sqrt(in), 1/sqrt(in)]).
    Weights stored pre-transposed: shape [in, out]."""
    ks = jax.random.split(key, 6)
    bound = 1.0 / jnp.sqrt(jnp.float32(n_features))

    def u(k, shape, b):
        return jax.random.uniform(k, shape, jnp.float32, minval=-b, maxval=b)

    return {
        "w0": u(ks[0], (n_features, n_features), bound),
        "b0": u(ks[1], (1, n_features), bound),
        "w1": u(ks[2], (n_features, n_features), bound),
        "b1": u(ks[3], (1, n_features), bound),
        "wo": u(ks[4], (n_features, 1), bound),
        "bo": u(ks[5], (1, 1), bound),
    }


if __name__ == "__main__":
    N = 32   # number of features (stand-in for len(data.pairs[-1]))
    B = 8    # batch size

    key = jax.random.PRNGKey(0)
    k_x, k_p = jax.random.split(key)
    x = jax.random.normal(k_x, (B, N), dtype=jnp.float32)
    params = init_params(k_p, N)

    packed = pack_params(params, N)         # one-time weight packing (hoisted out of the call)
    forward = jax.jit(discriminator_forward)
    out = jax.block_until_ready(forward(x, packed))

    ref = reference_forward(x, params)
    assert out.shape == (B, 1) and out.dtype == jnp.float32
    assert bool(jnp.all((out >= 0.0) & (out <= 1.0)))
    # bf16 MXU feed compounds over 4 matmuls -> small drift vs the f32 reference
    assert bool(jnp.allclose(out, ref, atol=3e-2)), (out, ref)
    print("KERNEL_OK")
</pallas_src>

<mosaic_0001>
module attributes {stable_mosaic.version = 11 : i64} {
  func.func @discriminator_kernel(%arg0: i32, %arg1: memref<8x128xbf16, #tpu.memory_space<vmem>>, %arg2: memref<128x128xbf16, #tpu.memory_space<vmem>>, %arg3: memref<1x128xf32, #tpu.memory_space<vmem>>, %arg4: memref<128x128xbf16, #tpu.memory_space<vmem>>, %arg5: memref<1x128xf32, #tpu.memory_space<vmem>>, %arg6: memref<128x4xf32, #tpu.memory_space<vmem>>, %arg7: memref<1x4xf32, #tpu.memory_space<vmem>>, %arg8: memref<8x4xf32, #tpu.memory_space<vmem>>) attributes {dimension_semantics = [#tpu.dimension_semantics<parallel>], iteration_bounds = array<i64: 1>, scalar_prefetch = 0 : i64, scratch_operands = 0 : i64, tpu.core_type = #tpu.core_type<tc>, window_params = [{transform_indices = @transform_0, window_bounds = array<i64: 8, 128>}, {pipeline_mode = #tpu.pipeline_mode<synchronous>, transform_indices = @transform_1, window_bounds = array<i64: 128, 128>}, {pipeline_mode = #tpu.pipeline_mode<synchronous>, transform_indices = @transform_2, window_bounds = array<i64: 1, 128>}, {pipeline_mode = #tpu.pipeline_mode<synchronous>, transform_indices = @transform_3, window_bounds = array<i64: 128, 128>}, {pipeline_mode = #tpu.pipeline_mode<synchronous>, transform_indices = @transform_4, window_bounds = array<i64: 1, 128>}, {pipeline_mode = #tpu.pipeline_mode<synchronous>, transform_indices = @transform_5, window_bounds = array<i64: 128, 4>}, {pipeline_mode = #tpu.pipeline_mode<synchronous>, transform_indices = @transform_6, window_bounds = array<i64: 1, 4>}, {transform_indices = @transform_7, window_bounds = array<i64: 8, 4>}]} {
    %c0 = arith.constant 0 : index
    %c0_0 = arith.constant 0 : index
    %0 = vector.load %arg1[%c0, %c0_0] : memref<8x128xbf16, #tpu.memory_space<vmem>>, vector<8x128xbf16>
    %c0_1 = arith.constant 0 : index
    %c0_2 = arith.constant 0 : index
    %1 = vector.load %arg2[%c0_1, %c0_2] : memref<128x128xbf16, #tpu.memory_space<vmem>>, vector<128x128xbf16>
    %c0_3 = arith.constant 0 : index
    %c0_4 = arith.constant 0 : index
    %2 = vector.load %arg3[%c0_3, %c0_4] : memref<1x128xf32, #tpu.memory_space<vmem>>, vector<1x128xf32>
    %c0_5 = arith.constant 0 : index
    %c0_6 = arith.constant 0 : index
    %3 = vector.load %arg4[%c0_5, %c0_6] : memref<128x128xbf16, #tpu.memory_space<vmem>>, vector<128x128xbf16>
    %c0_7 = arith.constant 0 : index
    %c0_8 = arith.constant 0 : index
    %4 = vector.load %arg5[%c0_7, %c0_8] : memref<1x128xf32, #tpu.memory_space<vmem>>, vector<1x128xf32>
    %c0_9 = arith.constant 0 : index
    %c0_10 = arith.constant 0 : index
    %5 = vector.load %arg6[%c0_9, %c0_10] : memref<128x4xf32, #tpu.memory_space<vmem>>, vector<128x4xf32>
    %c0_11 = arith.constant 0 : index
    %c0_12 = arith.constant 0 : index
    %6 = vector.load %arg7[%c0_11, %c0_12] : memref<1x4xf32, #tpu.memory_space<vmem>>, vector<1x4xf32>
    %cst = arith.constant dense<0.000000e+00> : vector<8x128xf32>
    %7 = tpu.matmul %0, %1, %cst {dimension_numbers = #tpu.dot_dimension_numbers<[1], [0], [0], [1], [0, 0, 1, 1], [], []>} : vector<8x128xbf16>, vector<128x128xbf16>, vector<8x128xf32> -> vector<8x128xf32>
    %8 = vector.broadcast %2 : vector<1x128xf32> to vector<8x128xf32>
    %9 = arith.addf %7, %8 : vector<8x128xf32>
    %cst_13 = arith.constant 2.000000e-01 : f32
    %10 = vector.broadcast %cst_13 : f32 to vector<8x128xf32>
    %11 = arith.mulf %10, %9 : vector<8x128xf32>
    %12 = arith.maximumf %9, %11 : vector<8x128xf32>
    %13 = arith.truncf %12 : vector<8x128xf32> to vector<8x128xbf16>
    %cst_14 = arith.constant dense<0.000000e+00> : vector<8x128xf32>
    %14 = tpu.matmul %13, %3, %cst_14 {dimension_numbers = #tpu.dot_dimension_numbers<[1], [0], [0], [1], [0, 0, 1, 1], [], []>} : vector<8x128xbf16>, vector<128x128xbf16>, vector<8x128xf32> -> vector<8x128xf32>
    %15 = vector.broadcast %4 : vector<1x128xf32> to vector<8x128xf32>
    %16 = arith.addf %14, %15 : vector<8x128xf32>
    %cst_15 = arith.constant 2.000000e-01 : f32
    %17 = vector.broadcast %cst_15 : f32 to vector<8x128xf32>
    %18 = arith.mulf %17, %16 : vector<8x128xf32>
    %19 = arith.maximumf %16, %18 : vector<8x128xf32>
    %20 = arith.truncf %19 : vector<8x128xf32> to vector<8x128xbf16>
    %cst_16 = arith.constant dense<0.000000e+00> : vector<8x128xf32>
    %21 = tpu.matmul %20, %3, %cst_16 {dimension_numbers = #tpu.dot_dimension_numbers<[1], [0], [0], [1], [0, 0, 1, 1], [], []>} : vector<8x128xbf16>, vector<128x128xbf16>, vector<8x128xf32> -> vector<8x128xf32>
    %22 = vector.broadcast %4 : vector<1x128xf32> to vector<8x128xf32>
    %23 = arith.addf %21, %22 : vector<8x128xf32>
    %cst_17 = arith.constant 2.000000e-01 : f32
    %24 = vector.broadcast %cst_17 : f32 to vector<8x128xf32>
    %25 = arith.mulf %24, %23 : vector<8x128xf32>
    %26 = arith.maximumf %23, %25 : vector<8x128xf32>
    %27 = arith.truncf %26 : vector<8x128xf32> to vector<8x128xbf16>
    %cst_18 = arith.constant dense<0.000000e+00> : vector<8x128xf32>
    %28 = tpu.matmul %27, %3, %cst_18 {dimension_numbers = #tpu.dot_dimension_numbers<[1], [0], [0], [1], [0, 0, 1, 1], [], []>} : vector<8x128xbf16>, vector<128x128xbf16>, vector<8x128xf32> -> vector<8x128xf32>
    %29 = vector.broadcast %4 : vector<1x128xf32> to vector<8x128xf32>
    %30 = arith.addf %28, %29 : vector<8x128xf32>
    %cst_19 = arith.constant 2.000000e-01 : f32
    %31 = vector.broadcast %cst_19 : f32 to vector<8x128xf32>
    %32 = arith.mulf %31, %30 : vector<8x128xf32>
    %33 = arith.maximumf %30, %32 : vector<8x128xf32>
    %cst_20 = arith.constant dense<0.000000e+00> : vector<8x4xf32>
    %34 = tpu.matmul %33, %5, %cst_20 {dimension_numbers = #tpu.dot_dimension_numbers<[1], [0], [0], [1], [0, 0, 1, 1], [], []>} : vector<8x128xf32>, vector<128x4xf32>, vector<8x4xf32> -> vector<8x4xf32>
    %35 = vector.broadcast %6 : vector<1x4xf32> to vector<8x4xf32>
    %36 = arith.addf %34, %35 : vector<8x4xf32>
    %cst_21 = arith.constant 0.000000e+00 : f32
    %37 = vector.broadcast %cst_21 : f32 to vector<8x4xf32>
    %38 = arith.subf %37, %36 : vector<8x4xf32>
    %39 = math.exp %38 : vector<8x4xf32>
    %cst_22 = arith.constant 1.000000e+00 : f32
    %40 = vector.broadcast %cst_22 : f32 to vector<8x4xf32>
    %41 = arith.addf %40, %39 : vector<8x4xf32>
    %cst_23 = arith.constant 1.000000e+00 : f32
    %42 = vector.broadcast %cst_23 : f32 to vector<8x4xf32>
    %43 = arith.divf %42, %41 : vector<8x4xf32>
    %c0_24 = arith.constant 0 : index
    %c0_25 = arith.constant 0 : index
    %44 = vector.load %arg8[%c0_24, %c0_25] : memref<8x4xf32, #tpu.memory_space<vmem>>, vector<8x4xf32>
    tpu.vector_store %arg8[%c0_24, %c0_25], %43 {strides = array<i32>} : memref<8x4xf32, #tpu.memory_space<vmem>>, vector<8x4xf32>,
    return
  }
  func.func @transform_0(%arg0: i32) -> (i32, i32) {
    %c0_i32 = arith.constant 0 : i32
    %c0_i32_0 = arith.constant 0 : i32
    return %arg0, %c0_i32 : i32, i32
  }
  func.func @transform_1(%arg0: i32) -> (i32, i32) {
    %c0_i32 = arith.constant 0 : i32
    %c0_i32_0 = arith.constant 0 : i32
    %c0_i32_1 = arith.constant 0 : i32
    return %c0_i32, %c0_i32_0 : i32, i32
  }
  func.func @transform_2(%arg0: i32) -> (i32, i32) {
    %c0_i32 = arith.constant 0 : i32
    %c0_i32_0 = arith.constant 0 : i32
    %c0_i32_1 = arith.constant 0 : i32
    return %c0_i32, %c0_i32_0 : i32, i32
  }
  func.func @transform_3(%arg0: i32) -> (i32, i32) {
    %c0_i32 = arith.constant 0 : i32
    %c0_i32_0 = arith.constant 0 : i32
    %c0_i32_1 = arith.constant 0 : i32
    return %c0_i32, %c0_i32_0 : i32, i32
  }
  func.func @transform_4(%arg0: i32) -> (i32, i32) {
    %c0_i32 = arith.constant 0 : i32
    %c0_i32_0 = arith.constant 0 : i32
    %c0_i32_1 = arith.constant 0 : i32
    return %c0_i32, %c0_i32_0 : i32, i32
  }
  func.func @transform_5(%arg0: i32) -> (i32, i32) {
    %c0_i32 = arith.constant 0 : i32
    %c0_i32_0 = arith.constant 0 : i32
    %c0_i32_1 = arith.constant 0 : i32
    return %c0_i32, %c0_i32_0 : i32, i32
  }
  func.func @transform_6(%arg0: i32) -> (i32, i32) {
    %c0_i32 = arith.constant 0 : i32
    %c0_i32_0 = arith.constant 0 : i32
    %c0_i32_1 = arith.constant 0 : i32
    return %c0_i32, %c0_i32_0 : i32, i32
  }
  func.func @transform_7(%arg0: i32) -> (i32, i32) {
    %c0_i32 = arith.constant 0 : i32
    %c0_i32_0 = arith.constant 0 : i32
    return %arg0, %c0_i32 : i32, i32
  }
}

</mosaic_0001>

<bundles_post_ra>
// kernel: discriminator_forward.1
= control target key start
LH: loop header
LB: loop body
LE: loop exit
PB: predicated region body
PF: predicated region fallthrough
CT: control target
= control target key end

     0   :  { %v680_v0 = vmov 0.0   ;;  %vm681_vm0 = vmmov 0   ;;  %v682_v36 = vmov 0.0|0.0   ;;  %vm440_vm1 = vcmask 31744   ;;  %s896_s1 = inlined_call_operand.vmem [shape: bf16[128,128], index: 1, kind: input, shape index: {}]   ;;  %s897_s3 = inlined_call_operand.vmem [shape: bf16[128,128], index: 3, kind: input, shape index: {}]   ;;  %s898_s0 = inlined_call_operand.vmem [shape: bf16[8,128], index: 0, kind: input, shape index: {}]   ;;  %s899_s2 = inlined_call_operand.vmem [shape: f32[1,128], index: 2, kind: input, shape index: {}]   ;;  %s900_s4 = inlined_call_operand.vmem [shape: f32[1,128], index: 4, kind: input, shape index: {}]   ;;  %s901_s5 = inlined_call_operand.vmem [shape: f32[128,4], index: 5, kind: input, shape index: {}]   ;;  %s902_s6 = inlined_call_operand.vmem [shape: f32[1,4], index: 6, kind: input, shape index: {}]   ;;  %s903_s7 = inlined_call_operand.vmem [shape: f32[8,4], index: 7, kind: output, shape index: {}]  }
   0x1   :  { %518 = vmatprep.subr.bf16.mxu0 %v680_v0  ;;  %v660_v1 = vld [vmem:[%s896_s1] sm:$0xff]   ;;  %534 = vmatprep.mubr.msk.bf16.mxu0 %vm681_vm0, %v680_v0  ;;  %v661_v2 = vld [vmem:[%s896_s1 + $0x8] sm:$0xff]   ;;  %v662_v3 = vld [vmem:[%s896_s1 + $0x10] sm:$0xff]  }
   0x2   :  { %538 = vmatprep.subr.bf16.mxu1 %v680_v0  ;;  %554 = vmatprep.mubr.msk.bf16.mxu1 %vm681_vm0, %v680_v0  ;;  %v743_v4 = vld [vmem:[%s897_s3] sm:$0xff]   ;;  %v663_v5 = vld [vmem:[%s896_s1 + $0x18] sm:$0xff]   ;;  %v753_v6 = vld [vmem:[%s897_s3 + $0x8] sm:$0xff]  }
   0x3   :  { %519 = vmatpush3.bf16.msra.mxu0 %v660_v1  ;;  %539 = vmatpush3.bf16.msra.mxu1 %v743_v4  ;;  %v664_v7 = vld [vmem:[%s896_s1 + $0x20] sm:$0xff]   ;;  %v762_v8 = vld [vmem:[%s897_s3 + $0x10] sm:$0xff]   ;;  %v665_v9 = vld [vmem:[%s896_s1 + $0x28] sm:$0xff]  }
   0x4   :  { %520 = vmatprep.subr.bf16.mxu0 %v680_v0  ;;  %540 = vmatprep.subr.bf16.mxu1 %v680_v0  ;;  %v671_v10 = vld [vmem:[%s897_s3 + $0x18] sm:$0xff]   ;;  %v666_v11 = vld [vmem:[%s896_s1 + $0x30] sm:$0xff]   ;;  %v672_v12 = vld [vmem:[%s897_s3 + $0x20] sm:$0xff]  }
   0x5   :  { %v667_v13 = vld [vmem:[%s896_s1 + $0x38] sm:$0xff]   ;;  %v673_v14 = vld [vmem:[%s897_s3 + $0x28] sm:$0xff]   ;;  %v27_v15 = vld [vmem:[%s898_s0] sm:$0xf] }
   0x6   :  { %v674_v16 = vld [vmem:[%s897_s3 + $0x30] sm:$0xff]   ;;  %v675_v17 = vld [vmem:[%s897_s3 + $0x38] sm:$0xff]   ;;  %v446_v18 = vld [vmem:[%s899_s2] ss:$0 sm:$0xff] }
   0x7   :  { %521 = vmatpush3.bf16.msra.mxu0 %v661_v2  ;;  %541 = vmatpush3.bf16.msra.mxu1 %v753_v6  ;;  %v835_v27 = vld [vmem:[%s900_s4] ss:$0 sm:$0xff]  ;;  %v63_v38 = vld [vmem:[%s901_s5 + $0x8] sm:$0xff]  ;;  %v64_v39 = vld [vmem:[%s901_s5 + $0x10] sm:$0xff] }
   0x8   :  { %522 = vmatprep.subr.bf16.mxu0 %v680_v0  ;;  %542 = vmatprep.subr.bf16.mxu1 %v680_v0  ;;  %v62_v37 = vld [vmem:[%s901_s5] sm:$0xff]  ;;  %v65_v41 = vld [vmem:[%s901_s5 + $0x18] sm:$0xff]  ;;  %v67_v44 = vld [vmem:[%s901_s5 + $0x28] sm:$0xff] }
   0x9   :  { %v634_v40 = vpack.c.bf16 %v63_v38, %v62_v37  ;;  %v637_v42 = vpack.c.bf16 %v65_v41, %v64_v39  ;;  %v66_v43 = vld [vmem:[%s901_s5 + $0x20] sm:$0xff]  ;;  %v68_v46 = vld [vmem:[%s901_s5 + $0x30] sm:$0xff]  ;;  %v69_v47 = vld [vmem:[%s901_s5 + $0x38] sm:$0xff] }
   0xa   :  { %v640_v45 = vpack.c.bf16 %v67_v44, %v66_v43  ;;  %v643_v48 = vpack.c.bf16 %v69_v47, %v68_v46  ;;  %v70_v49 = vld [vmem:[%s901_s5 + $0x40] sm:$0xff]  ;;  %v71_v50 = vld [vmem:[%s901_s5 + $0x48] sm:$0xff]  ;;  %v72_v52 = vld [vmem:[%s901_s5 + $0x50] sm:$0xff] }
   0xb   :  { %523 = vmatpush3.bf16.msra.mxu0 %v662_v3  ;;  %543 = vmatpush3.bf16.msra.mxu1 %v762_v8  ;;  %v646_v51 = vpack.c.bf16 %v71_v50, %v70_v49  ;;  %v73_v53 = vld [vmem:[%s901_s5 + $0x58] sm:$0xff]  ;;  %v74_v63 = vld [vmem:[%s901_s5 + $0x60] sm:$0xff]  ;;  %v76_v2 = vld [vmem:[%s901_s5 + $0x70] sm:$0xff] }
   0xc   :  { %524 = vmatprep.subr.bf16.mxu0 %v680_v0  ;;  %544 = vmatprep.subr.bf16.mxu1 %v680_v0  ;;  %v649_v54 = vpack.c.bf16 %v73_v53, %v72_v52  ;;  %v77_v3 = vld [vmem:[%s901_s5 + $0x78] sm:$0xff] }
   0xf   :  { %525 = vmatpush3.bf16.msra.mxu0 %v663_v5  ;;  %545 = vmatpush3.bf16.msra.mxu1 %v671_v10 }
  0x10   :  { %526 = vmatprep.subr.bf16.mxu0 %v680_v0  ;;  %546 = vmatprep.subr.bf16.mxu1 %v680_v0 }
  0x13   :  { %527 = vmatpush3.bf16.msra.mxu0 %v664_v7  ;;  %547 = vmatpush3.bf16.msra.mxu1 %v672_v12 }
  0x14   :  { %528 = vmatprep.subr.bf16.mxu0 %v680_v0  ;;  %548 = vmatprep.subr.bf16.mxu1 %v680_v0 }
  0x17   :  { %529 = vmatpush3.bf16.msra.mxu0 %v665_v9  ;;  %549 = vmatpush3.bf16.msra.mxu1 %v673_v14 }
  0x18   :  { %530 = vmatprep.subr.bf16.mxu0 %v680_v0  ;;  %550 = vmatprep.subr.bf16.mxu1 %v680_v0 }
  0x1b   :  { %531 = vmatpush3.bf16.msra.mxu0 %v666_v11  ;;  %551 = vmatpush3.bf16.msra.mxu1 %v674_v16 }
  0x1c   :  { %532 = vmatprep.subr.bf16.mxu0 %v680_v0  ;;  %552 = vmatprep.subr.bf16.mxu1 %v680_v0 }
  0x1f   :  { %533 = vmatpush3.bf16.msra.mxu0 %v667_v13  ;;  %553 = vmatpush3.bf16.msra.mxu1 %v675_v17 }
  0x20   :  { %558 = vmatprep.subr.bf16.mxu0 %v680_v0  ;;  %578 = vmatprep.subr.bf16.mxu1 %v680_v0 }
  0x22   :  { %535 = vmatmul.mubr.bf16.vlgmr.msra.gmra.mrb[0].mxu0 %v27_v15 }
  0x23   :  { %559 = vmatpush3.bf16.msra.mxu0 %v743_v4  ;;  %574 = vmatprep.mubr.msk.bf16.mxu0 %vm681_vm0, %v680_v0 }
  0x24   :  { %560 = vmatprep.subr.bf16.mxu0 %v680_v0 }
  0x27   :  { %561 = vmatpush3.bf16.msra.mxu0 %v753_v6 }
  0x28   :  { %562 = vmatprep.subr.bf16.mxu0 %v680_v0 }
  0x2b   :  { %563 = vmatpush3.bf16.msra.mxu0 %v762_v8 }
  0x2c   :  { %564 = vmatprep.subr.bf16.mxu0 %v680_v0 }
  0x2f   :  { %565 = vmatpush3.bf16.msra.mxu0 %v671_v10 }
  0x30   :  { %566 = vmatprep.subr.bf16.mxu0 %v680_v0 }
  0x33   :  { %567 = vmatpush3.bf16.msra.mxu0 %v672_v12 }
  0x34   :  { %568 = vmatprep.subr.bf16.mxu0 %v680_v0 }
  0x37   :  { %569 = vmatpush3.bf16.msra.mxu0 %v673_v14 }
  0x38   :  { %570 = vmatprep.subr.bf16.mxu0 %v680_v0 }
  0x3b   :  { %571 = vmatpush3.bf16.msra.mxu0 %v674_v16 }
  0x3c   :  { %572 = vmatprep.subr.bf16.mxu0 %v680_v0 }
  0x3f   :  { %573 = vmatpush3.bf16.msra.mxu0 %v675_v17 }
  0x40   :  { %633 = vmatprep.subr.bf16.mxu0 %v682_v36 }
  0xf5   :  { %v167_v19 = vpop.f32.mrb[0].mxu0 }
  0xf6   :  { %v168_v20 = vadd.f32 %v446_v18, %v167_v19  ;;  %v536_v21 = vpop.f32.mrb[1].mxu0 }
  0xf7   :  { %v170_v22 = vpop.f32.mrb[2].mxu0 }
  0xf8   :  { %v173_v23 = vmul.f32 0.2, %v168_v20  ;;  %v537_v24 = vpop.f32.mrb[3].mxu0 }
  0xfa   :  { %v174_v25 = vmax.f32 %v168_v20, %v173_v23 }
  0xfc   :  { %v175_v26 = vpack.c.bf16 %v174_v25, %v174_v25 }
  0xfe   :  { %555 = vmatmul.mubr.bf16.vlgmr.msra.gmra.mrb[0].mxu1 %v175_v26 }
  0xff   :  { %579 = vmatpush3.bf16.msra.mxu1 %v743_v4  ;;  %594 = vmatprep.mubr.msk.bf16.mxu1 %vm681_vm0, %v680_v0  ;;  %v655_v4 = vpack.c.bf16 %v77_v3, %v76_v2 }
 0x100   :  { %580 = vmatprep.subr.bf16.mxu1 %v680_v0 }
 0x103   :  { %581 = vmatpush3.bf16.msra.mxu1 %v753_v6 }
 0x104   :  { %582 = vmatprep.subr.bf16.mxu1 %v680_v0 }
 0x107   :  { %583 = vmatpush3.bf16.msra.mxu1 %v762_v8 }
 0x108   :  { %584 = vmatprep.subr.bf16.mxu1 %v680_v0 }
 0x10b   :  { %585 = vmatpush3.bf16.msra.mxu1 %v671_v10 }
 0x10c   :  { %586 = vmatprep.subr.bf16.mxu1 %v680_v0 }
 0x10f   :  { %587 = vmatpush3.bf16.msra.mxu1 %v672_v12  ;;  %v464_v12 = vld [vmem:[%s902_s6] ss:$0 sm:$0xff] }
 0x110   :  { %588 = vmatprep.subr.bf16.mxu1 %v680_v0 }
 0x113   :  { %589 = vmatpush3.bf16.msra.mxu1 %v673_v14 }
 0x114   :  { %590 = vmatprep.subr.bf16.mxu1 %v680_v0 }
 0x117   :  { %591 = vmatpush3.bf16.msra.mxu1 %v674_v16 }
 0x118   :  { %592 = vmatprep.subr.bf16.mxu1 %v680_v0 }
 0x11b   :  { %593 = vmatpush3.bf16.msra.mxu1 %v675_v17 }
 0x1d1   :  { %v264_v28 = vpop.f32.mrb[0].mxu1 }
 0x1d2   :  { %v265_v29 = vadd.f32 %v835_v27, %v264_v28  ;;  %v556_v30 = vpop.f32.mrb[1].mxu1 }
 0x1d3   :  { %v267_v31 = vpop.f32.mrb[2].mxu1 }
 0x1d4   :  { %v270_v32 = vmul.f32 0.2, %v265_v29  ;;  %v557_v33 = vpop.f32.mrb[3].mxu1 }
 0x1d6   :  { %v271_v34 = vmax.f32 %v265_v29, %v270_v32 }
 0x1d8   :  { %v272_v35 = vpack.c.bf16 %v271_v34, %v271_v34 }
 0x1da   :  { %575 = vmatmul.mubr.bf16.vlgmr.msra.gmra.mrb[4].mxu0 %v272_v35 }
 0x1db   :  { %630 = vmatprep.mubr.msk.f32.mxu0 %vm681_vm0, %v680_v0  ;;  %635 = vmatpush3.bf16.msra.mxu0 %v634_v40  ;;  %v75_v0 = vld [vmem:[%s901_s5 + $0x68] sm:$0xff] }
 0x1dc   :  { %636 = vmatprep.subr.bf16.mxu0 %v682_v36  ;;  %v652_v1 = vpack.c.bf16 %v75_v0, %v74_v63 }
 0x1df   :  { %638 = vmatpush3.bf16.msra.mxu0 %v637_v42 }
 0x1e0   :  { %639 = vmatprep.subr.bf16.mxu0 %v682_v36 }
 0x1e3   :  { %641 = vmatpush3.bf16.msra.mxu0 %v640_v45 }
 0x1e4   :  { %642 = vmatprep.subr.bf16.mxu0 %v682_v36 }
 0x1e7   :  { %644 = vmatpush3.bf16.msra.mxu0 %v643_v48 }
 0x1e8   :  { %645 = vmatprep.subr.bf16.mxu0 %v682_v36 }
 0x1eb   :  { %647 = vmatpush3.bf16.msra.mxu0 %v646_v51 }
 0x1ec   :  { %648 = vmatprep.subr.bf16.mxu0 %v682_v36 }
 0x1ef   :  { %650 = vmatpush3.bf16.msra.mxu0 %v649_v54 }
 0x1f0   :  { %651 = vmatprep.subr.bf16.mxu0 %v682_v36 }
 0x1f3   :  { %653 = vmatpush3.bf16.msra.mxu0 %v652_v1 }
 0x1f4   :  { %654 = vmatprep.subr.bf16.mxu0 %v682_v36 }
 0x1f7   :  { %656 = vmatpush3.bf16.msra.mxu0 %v655_v4 }
 0x2ad   :  { %v307_v55 = vpop.f32.mrb[4].mxu0 }
 0x2ae   :  { %v308_v56 = vadd.f32 %v835_v27, %v307_v55  ;;  %v576_v57 = vpop.f32.mrb[5].mxu0 }
 0x2af   :  { %v310_v58 = vpop.f32.mrb[6].mxu0 }
 0x2b0   :  { %v313_v59 = vmul.f32 0.2, %v308_v56  ;;  %v577_v60 = vpop.f32.mrb[7].mxu0 }
 0x2b2   :  { %v314_v61 = vmax.f32 %v308_v56, %v313_v59 }
 0x2b4   :  { %v315_v62 = vpack.c.bf16 %v314_v61, %v314_v61 }
 0x2b6   :  { %595 = vmatmul.mubr.bf16.vlgmr.msra.gmra.mrb[4].mxu1 %v315_v62 }
 0x389   :  { %v350_v5 = vpop.f32.mrb[4].mxu1 }
 0x38a   :  { %v351_v6 = vadd.f32 %v835_v27, %v350_v5  ;;  %v596_v7 = vpop.f32.mrb[5].mxu1 }
 0x38b   :  { %v353_v8 = vpop.f32.mrb[6].mxu1 }
 0x38c   :  { %v356_v9 = vmul.f32 0.2, %v351_v6  ;;  %v597_v10 = vpop.f32.mrb[7].mxu1 }
 0x38e   :  { %v357_v11 = vmax.f32 %v351_v6, %v356_v9 }
 0x390   :  { %631 = vmatmul.mubr.f32.vlgmr.msra.gmra.mrb[8].mxu0 %v357_v11 }
 0x463   :  { %v430_v13 = vpop.f32.mrb[8].mxu0 }
 0x464   :  { %v431_v14 = vadd.f32 %v464_v12, %v430_v13  ;;  %v632_v15 = vpop.f32.mrb[9].mxu0 }
 0x466   :  { %v434_v16 = vsub.f32 0.0, %v431_v14 }
 0x468   :  { %v435_v17 = vmul.f32 1.442695, %v434_v16 }
 0x46a   :  { %676 = vpow2.f32 %v435_v17 }
 0x474   :  { %v677_v18 = vpop.eup %676 }
 0x475   :  { %v437_v19 = vadd.f32 1.0, %v677_v18 }
 0x477   :  { %678 = vrcp.f32 %v437_v19 }
 0x481   :  { %v679_v20 = vpop.eup %678 }
 0x482   :  { %441 = vst.msk [vmem:[%s903_s7] sm:$0xff] %vm440_vm1, %v679_v20 }

</bundles_post_ra>
